<compile_context>
chip_gen: v5e
topology: v5e:2x2
jax: 0.10.0
libtpu: 0.0.40
codegen_flags: <defaults>
</compile_context>

<pallas_src>
import functools

import jax
import jax.numpy as jnp
from jax.experimental import pallas as pl
from jax.experimental.pallas import tpu as pltpu

_NORMALIZE_EPS = 1e-12   # F.normalize default eps
_COSSIM_EPS = 1e-8       # F.cosine_similarity default eps
_LANES = 128
_VMEM_INPUT_BUDGET = 16 * 1024 * 1024   # bytes for double-buffered input tiles
_VMEM_LIMIT = 32 * 1024 * 1024          # scoped VMEM limit (safe on v5e/v6e/v7x)


def _round_up(x, m):
    return ((x + m - 1) // m) * m


def _consistency_kernel(scale_ref, *refs, has_mask):
    """Streaming reduction kernel over the row axis of [B, R, 128] inputs."""
    if has_mask:
        (p1_ref, p2_ref, m1_ref, m2_ref, out_ref,
         a12, a11, a22, b12, b11, b22) = refs
        accs = (a12, a11, a22, b12, b11, b22)
    else:
        p1_ref, p2_ref, out_ref, a12, a11, a22 = refs
        accs = (a12, a11, a22)

    k = pl.program_id(0)

    @pl.when(k == 0)
    def _init():
        for acc in accs:
            acc[...] = jnp.zeros_like(acc)

    # Hot loop: elementwise products + sublane-partial accumulation only.
    p1 = p1_ref[...].astype(jnp.float32)
    p2 = p2_ref[...].astype(jnp.float32)
    a12[...] += jnp.sum(p1 * p2, axis=1, keepdims=True)   # (B, 1, 128)
    a11[...] += jnp.sum(p1 * p1, axis=1, keepdims=True)
    a22[...] += jnp.sum(p2 * p2, axis=1, keepdims=True)
    if has_mask:
        m1 = m1_ref[...].astype(jnp.float32)
        m2 = m2_ref[...].astype(jnp.float32)
        b12[...] += jnp.sum(m1 * m2, axis=1, keepdims=True)
        b11[...] += jnp.sum(m1 * m1, axis=1, keepdims=True)
        b22[...] += jnp.sum(m2 * m2, axis=1, keepdims=True)

    @pl.when(k == pl.num_programs(0) - 1)
    def _finalize():
        dot12 = jnp.sum(a12[...], axis=2)                  # (B, 1)
        n1sq = jnp.sum(a11[...], axis=2)
        n2sq = jnp.sum(a22[...], axis=2)
        # F.normalize: row / max(||row||, eps) -> rsqrt(max(||.||^2, eps^2))
        inv1 = jax.lax.rsqrt(jnp.maximum(n1sq, _NORMALIZE_EPS * _NORMALIZE_EPS))
        inv2 = jax.lax.rsqrt(jnp.maximum(n2sq, _NORMALIZE_EPS * _NORMALIZE_EPS))
        # scale_ref[0] = 1 / (B * temperature): mean and temperature folded.
        loss = -jnp.sum(dot12 * inv1 * inv2) * scale_ref[0]
        if has_mask:
            dotm = jnp.sum(b12[...], axis=2)
            nm1sq = jnp.sum(b11[...], axis=2)
            nm2sq = jnp.sum(b22[...], axis=2)
            # F.cosine_similarity: x.y / max(||x||*||y||, eps)
            invm = jax.lax.rsqrt(
                jnp.maximum(nm1sq * nm2sq, _COSSIM_EPS * _COSSIM_EPS))
            loss = loss - jnp.sum(dotm * invm) * scale_ref[1]
        out_ref[0, 0] = loss


def consistency_loss(pred1, pred2, mask1=None, mask2=None, temperature=0.1,
                     max_tile_rows=2048):
    """Pallas equivalent of ConsistencyLoss.forward. Inputs are NCHW."""
    B = pred1.shape[0]
    has_mask = mask1 is not None and mask2 is not None

    inputs = [pred1.reshape(B, -1), pred2.reshape(B, -1)]
    if has_mask:
        inputs += [mask1.reshape(B, -1), mask2.reshape(B, -1)]
    n_inputs = len(inputs)
    N = inputs[0].shape[1]

    # Dtype-aware sublane alignment for the second-to-last block dim.
    min_itemsize = min(x.dtype.itemsize for x in inputs)
    sublanes = 8 * max(1, 4 // min_itemsize)

    # Rows of 128 lanes needed to hold N elements.
    R = pl.cdiv(N, _LANES)

    # Tile rows sized against the VMEM budget (inputs are double-buffered by
    # the BlockSpec pipeline).  Stays within the 32 MiB scoped limit on every
    # TPU generation (incl. v7x's 64 MiB physical VMEM).
    bytes_per_row = 2 * B * _LANES * sum(x.dtype.itemsize for x in inputs)
    tile_r = max(1, _VMEM_INPUT_BUDGET // bytes_per_row)
    tile_r = min(tile_r, max_tile_rows)
    tile_r = max(sublanes, (tile_r // sublanes) * sublanes)
    tile_r = min(tile_r, _round_up(R, sublanes))

    R_pad = _round_up(R, tile_r)
    N_pad = R_pad * _LANES
    num_tiles = R_pad // tile_r

    def prep(x):
        # Zero padding is safe: zeros contribute nothing to dots / sq-norms.
        if N_pad != N:
            x = jnp.pad(x, ((0, 0), (0, N_pad - N)))
        return x.reshape(B, R_pad, _LANES)

    inputs = [prep(x) for x in inputs]

    # [1/(B*temperature), 1/B] as an SMEM scalar array (no recompile when
    # temperature changes).
    scale = jnp.array([1.0 / (B * float(temperature)), 1.0 / B],
                      dtype=jnp.float32)

    block_spec = pl.BlockSpec((B, tile_r, _LANES), lambda k: (0, k, 0))
    in_specs = ([pl.BlockSpec(memory_space=pltpu.SMEM)]
                + [block_spec] * n_inputs)
    n_acc = 6 if has_mask else 3
    scratch_shapes = [pltpu.VMEM((B, 1, _LANES), jnp.float32)] * n_acc

    bytes_accessed = sum(int(x.size) * x.dtype.itemsize for x in inputs) + 4
    flops = 2 * n_acc * B * N_pad
    transcendentals = (3 if has_mask else 2) * B

    kernel = functools.partial(_consistency_kernel, has_mask=has_mask)
    out = pl.pallas_call(
        kernel,
        out_shape=jax.ShapeDtypeStruct((1, 1), jnp.float32),
        grid=(num_tiles,),
        in_specs=in_specs,
        out_specs=pl.BlockSpec(memory_space=pltpu.SMEM),
        scratch_shapes=scratch_shapes,
        compiler_params=pltpu.CompilerParams(
            dimension_semantics=("arbitrary",),
            vmem_limit_bytes=_VMEM_LIMIT),
        cost_estimate=pl.CostEstimate(
            flops=flops,
            transcendentals=transcendentals,
            bytes_accessed=bytes_accessed),
    )(scale, *inputs)

    return out[0, 0]


def _reference(pred1, pred2, mask1=None, mask2=None, temperature=0.1):
    """Pure-JAX reference mirroring the PyTorch module."""
    B = pred1.shape[0]
    p1 = pred1.reshape(B, -1).astype(jnp.float32)
    p2 = pred2.reshape(B, -1).astype(jnp.float32)
    n1 = jnp.maximum(jnp.linalg.norm(p1, axis=1, keepdims=True), _NORMALIZE_EPS)
    n2 = jnp.maximum(jnp.linalg.norm(p2, axis=1, keepdims=True), _NORMALIZE_EPS)
    sim = jnp.sum((p1 / n1) * (p2 / n2), axis=1) / temperature
    loss = -jnp.mean(sim)
    if mask1 is not None and mask2 is not None:
        m1 = mask1.reshape(B, -1).astype(jnp.float32)
        m2 = mask2.reshape(B, -1).astype(jnp.float32)
        cos = jnp.sum(m1 * m2, axis=1) / jnp.maximum(
            jnp.linalg.norm(m1, axis=1) * jnp.linalg.norm(m2, axis=1),
            _COSSIM_EPS)
        loss = loss - jnp.mean(cos)
    return loss


if __name__ == "__main__":
    key = jax.random.PRNGKey(0)
    k1, k2, k3, k4 = jax.random.split(key, 4)

    B, C, H, W = 2, 1, 16, 16
    pred1 = jax.random.normal(k1, (B, C, H, W), dtype=jnp.float32)
    pred2 = jax.random.normal(k2, (B, C, H, W), dtype=jnp.float32)
    mask1 = (jax.random.uniform(k3, (B, C, H, W)) > 0.5).astype(jnp.float32)
    mask2 = (jax.random.uniform(k4, (B, C, H, W)) > 0.5).astype(jnp.float32)

    # 1) masked, single-tile
    got = consistency_loss(pred1, pred2, mask1, mask2, temperature=0.1)
    jax.block_until_ready(got)
    want = _reference(pred1, pred2, mask1, mask2, temperature=0.1)
    assert jnp.allclose(got, want, rtol=1e-5, atol=1e-5), (got, want)

    # 2) no masks
    got = consistency_loss(pred1, pred2, temperature=0.1)
    jax.block_until_ready(got)
    want = _reference(pred1, pred2, temperature=0.1)
    assert jnp.allclose(got, want, rtol=1e-5, atol=1e-5), (got, want)

    # 3) N not divisible by 128 (exercises zero-padding path)
    ka, kb = jax.random.split(k1)
    p1b = jax.random.normal(ka, (B, C, 18, 18), dtype=jnp.float32)
    p2b = jax.random.normal(kb, (B, C, 18, 18), dtype=jnp.float32)
    got = consistency_loss(p1b, p2b, temperature=0.2)
    jax.block_until_ready(got)
    want = _reference(p1b, p2b, temperature=0.2)
    assert jnp.allclose(got, want, rtol=1e-5, atol=1e-5), (got, want)

    # 4) multi-tile grid (forces accumulation across grid steps), masked
    kc, kd, ke, kf = jax.random.split(k2, 4)
    p1c = jax.random.normal(kc, (B, C, 64, 64), dtype=jnp.float32)
    p2c = jax.random.normal(kd, (B, C, 64, 64), dtype=jnp.float32)
    m1c = (jax.random.uniform(ke, (B, C, 64, 64)) > 0.5).astype(jnp.float32)
    m2c = (jax.random.uniform(kf, (B, C, 64, 64)) > 0.5).astype(jnp.float32)
    got = consistency_loss(p1c, p2c, m1c, m2c, temperature=0.1,
                           max_tile_rows=8)
    jax.block_until_ready(got)
    want = _reference(p1c, p2c, m1c, m2c, temperature=0.1)
    assert jnp.allclose(got, want, rtol=1e-5, atol=1e-5), (got, want)

    # 5) bf16 inputs streamed in native dtype (cast to f32 inside the kernel)
    p1d = jax.random.normal(kc, (B, C, 64, 64), dtype=jnp.bfloat16)
    p2d = jax.random.normal(kd, (B, C, 64, 64), dtype=jnp.bfloat16)
    got = consistency_loss(p1d, p2d, temperature=0.1, max_tile_rows=16)
    jax.block_until_ready(got)
    want = _reference(p1d, p2d, temperature=0.1)
    assert jnp.allclose(got, want, rtol=1e-4, atol=1e-4), (got, want)

    print("KERNEL_OK")
</pallas_src>

<mosaic_0001>
module attributes {stable_mosaic.version = 11 : i64} {
  func.func @_consistency_kernel(%arg0: i32, %arg1: memref<2xf32, #tpu.memory_space<smem>>, %arg2: memref<2x8x128xf32, #tpu.memory_space<vmem>>, %arg3: memref<2x8x128xf32, #tpu.memory_space<vmem>>, %arg4: memref<2x8x128xf32, #tpu.memory_space<vmem>>, %arg5: memref<2x8x128xf32, #tpu.memory_space<vmem>>, %arg6: memref<1x1xf32, #tpu.memory_space<smem>>, %arg7: memref<2x1x128xf32, #tpu.memory_space<vmem>>, %arg8: memref<2x1x128xf32, #tpu.memory_space<vmem>>, %arg9: memref<2x1x128xf32, #tpu.memory_space<vmem>>, %arg10: memref<2x1x128xf32, #tpu.memory_space<vmem>>, %arg11: memref<2x1x128xf32, #tpu.memory_space<vmem>>, %arg12: memref<2x1x128xf32, #tpu.memory_space<vmem>>) attributes {dimension_semantics = [#tpu.dimension_semantics<arbitrary>], iteration_bounds = array<i64: 1>, scalar_prefetch = 0 : i64, scratch_operands = 6 : i64, tpu.core_type = #tpu.core_type<tc>, window_params = [{transform_indices = @transform_0, window_bounds = array<i64: 2>}, {transform_indices = @transform_1, window_bounds = array<i64: 2, 8, 128>}, {transform_indices = @transform_2, window_bounds = array<i64: 2, 8, 128>}, {transform_indices = @transform_3, window_bounds = array<i64: 2, 8, 128>}, {transform_indices = @transform_4, window_bounds = array<i64: 2, 8, 128>}, {transform_indices = @transform_5, window_bounds = array<i64: 1, 1>}]} {
    %c0_i32 = arith.constant 0 : i32
    %0 = arith.cmpi eq, %arg0, %c0_i32 : i32
    %1 = arith.extui %0 : i1 to i32
    %c0_i32_0 = arith.constant 0 : i32
    %2 = arith.cmpi ne, %1, %c0_i32_0 : i32
    scf.if %2 {
      %cst_55 = arith.constant 0.000000e+00 : f32
      %46 = vector.broadcast %cst_55 : f32 to vector<2x1x128xf32>
      %c0_56 = arith.constant 0 : index
      %c0_57 = arith.constant 0 : index
      %c0_58 = arith.constant 0 : index
      %47 = vector.load %arg7[%c0_56, %c0_57, %c0_58] : memref<2x1x128xf32, #tpu.memory_space<vmem>>, vector<2x1x128xf32>
      tpu.vector_store %arg7[%c0_56, %c0_57, %c0_58], %46 {strides = array<i32>} : memref<2x1x128xf32, #tpu.memory_space<vmem>>, vector<2x1x128xf32>,
      %cst_59 = arith.constant 0.000000e+00 : f32
      %48 = vector.broadcast %cst_59 : f32 to vector<2x1x128xf32>
      %c0_60 = arith.constant 0 : index
      %c0_61 = arith.constant 0 : index
      %c0_62 = arith.constant 0 : index
      %49 = vector.load %arg8[%c0_60, %c0_61, %c0_62] : memref<2x1x128xf32, #tpu.memory_space<vmem>>, vector<2x1x128xf32>
      tpu.vector_store %arg8[%c0_60, %c0_61, %c0_62], %48 {strides = array<i32>} : memref<2x1x128xf32, #tpu.memory_space<vmem>>, vector<2x1x128xf32>,
      %cst_63 = arith.constant 0.000000e+00 : f32
      %50 = vector.broadcast %cst_63 : f32 to vector<2x1x128xf32>
      %c0_64 = arith.constant 0 : index
      %c0_65 = arith.constant 0 : index
      %c0_66 = arith.constant 0 : index
      %51 = vector.load %arg9[%c0_64, %c0_65, %c0_66] : memref<2x1x128xf32, #tpu.memory_space<vmem>>, vector<2x1x128xf32>
      tpu.vector_store %arg9[%c0_64, %c0_65, %c0_66], %50 {strides = array<i32>} : memref<2x1x128xf32, #tpu.memory_space<vmem>>, vector<2x1x128xf32>,
      %cst_67 = arith.constant 0.000000e+00 : f32
      %52 = vector.broadcast %cst_67 : f32 to vector<2x1x128xf32>
      %c0_68 = arith.constant 0 : index
      %c0_69 = arith.constant 0 : index
      %c0_70 = arith.constant 0 : index
      %53 = vector.load %arg10[%c0_68, %c0_69, %c0_70] : memref<2x1x128xf32, #tpu.memory_space<vmem>>, vector<2x1x128xf32>
      tpu.vector_store %arg10[%c0_68, %c0_69, %c0_70], %52 {strides = array<i32>} : memref<2x1x128xf32, #tpu.memory_space<vmem>>, vector<2x1x128xf32>,
      %cst_71 = arith.constant 0.000000e+00 : f32
      %54 = vector.broadcast %cst_71 : f32 to vector<2x1x128xf32>
      %c0_72 = arith.constant 0 : index
      %c0_73 = arith.constant 0 : index
      %c0_74 = arith.constant 0 : index
      %55 = vector.load %arg11[%c0_72, %c0_73, %c0_74] : memref<2x1x128xf32, #tpu.memory_space<vmem>>, vector<2x1x128xf32>
      tpu.vector_store %arg11[%c0_72, %c0_73, %c0_74], %54 {strides = array<i32>} : memref<2x1x128xf32, #tpu.memory_space<vmem>>, vector<2x1x128xf32>,
      %cst_75 = arith.constant 0.000000e+00 : f32
      %56 = vector.broadcast %cst_75 : f32 to vector<2x1x128xf32>
      %c0_76 = arith.constant 0 : index
      %c0_77 = arith.constant 0 : index
      %c0_78 = arith.constant 0 : index
      %57 = vector.load %arg12[%c0_76, %c0_77, %c0_78] : memref<2x1x128xf32, #tpu.memory_space<vmem>>, vector<2x1x128xf32>
      tpu.vector_store %arg12[%c0_76, %c0_77, %c0_78], %56 {strides = array<i32>} : memref<2x1x128xf32, #tpu.memory_space<vmem>>, vector<2x1x128xf32>,
    } else {
    }
    %c0 = arith.constant 0 : index
    %c0_1 = arith.constant 0 : index
    %c0_2 = arith.constant 0 : index
    %3 = vector.load %arg2[%c0, %c0_1, %c0_2] : memref<2x8x128xf32, #tpu.memory_space<vmem>>, vector<2x8x128xf32>
    %c0_3 = arith.constant 0 : index
    %c0_4 = arith.constant 0 : index
    %c0_5 = arith.constant 0 : index
    %4 = vector.load %arg3[%c0_3, %c0_4, %c0_5] : memref<2x8x128xf32, #tpu.memory_space<vmem>>, vector<2x8x128xf32>
    %c0_6 = arith.constant 0 : index
    %c0_7 = arith.constant 0 : index
    %c0_8 = arith.constant 0 : index
    %5 = vector.load %arg7[%c0_6, %c0_7, %c0_8] : memref<2x1x128xf32, #tpu.memory_space<vmem>>, vector<2x1x128xf32>
    %6 = arith.mulf %3, %4 : vector<2x8x128xf32>
    %cst = arith.constant dense<0.000000e+00> : vector<2x128xf32>
    %7 = vector.multi_reduction <add>, %6, %cst [1] : vector<2x8x128xf32> to vector<2x128xf32>
    %8 = vector.shape_cast %7 : vector<2x128xf32> to vector<2x1x128xf32>
    %9 = arith.addf %5, %8 : vector<2x1x128xf32>
    %c0_9 = arith.constant 0 : index
    %c0_10 = arith.constant 0 : index
    %c0_11 = arith.constant 0 : index
    %10 = vector.load %arg7[%c0_9, %c0_10, %c0_11] : memref<2x1x128xf32, #tpu.memory_space<vmem>>, vector<2x1x128xf32>
    tpu.vector_store %arg7[%c0_9, %c0_10, %c0_11], %9 {strides = array<i32>} : memref<2x1x128xf32, #tpu.memory_space<vmem>>, vector<2x1x128xf32>,
    %c0_12 = arith.constant 0 : index
    %c0_13 = arith.constant 0 : index
    %c0_14 = arith.constant 0 : index
    %11 = vector.load %arg8[%c0_12, %c0_13, %c0_14] : memref<2x1x128xf32, #tpu.memory_space<vmem>>, vector<2x1x128xf32>
    %12 = arith.mulf %3, %3 : vector<2x8x128xf32>
    %cst_15 = arith.constant dense<0.000000e+00> : vector<2x128xf32>
    %13 = vector.multi_reduction <add>, %12, %cst_15 [1] : vector<2x8x128xf32> to vector<2x128xf32>
    %14 = vector.shape_cast %13 : vector<2x128xf32> to vector<2x1x128xf32>
    %15 = arith.addf %11, %14 : vector<2x1x128xf32>
    %c0_16 = arith.constant 0 : index
    %c0_17 = arith.constant 0 : index
    %c0_18 = arith.constant 0 : index
    %16 = vector.load %arg8[%c0_16, %c0_17, %c0_18] : memref<2x1x128xf32, #tpu.memory_space<vmem>>, vector<2x1x128xf32>
    tpu.vector_store %arg8[%c0_16, %c0_17, %c0_18], %15 {strides = array<i32>} : memref<2x1x128xf32, #tpu.memory_space<vmem>>, vector<2x1x128xf32>,
    %c0_19 = arith.constant 0 : index
    %c0_20 = arith.constant 0 : index
    %c0_21 = arith.constant 0 : index
    %17 = vector.load %arg9[%c0_19, %c0_20, %c0_21] : memref<2x1x128xf32, #tpu.memory_space<vmem>>, vector<2x1x128xf32>
    %18 = arith.mulf %4, %4 : vector<2x8x128xf32>
    %cst_22 = arith.constant dense<0.000000e+00> : vector<2x128xf32>
    %19 = vector.multi_reduction <add>, %18, %cst_22 [1] : vector<2x8x128xf32> to vector<2x128xf32>
    %20 = vector.shape_cast %19 : vector<2x128xf32> to vector<2x1x128xf32>
    %21 = arith.addf %17, %20 : vector<2x1x128xf32>
    %c0_23 = arith.constant 0 : index
    %c0_24 = arith.constant 0 : index
    %c0_25 = arith.constant 0 : index
    %22 = vector.load %arg9[%c0_23, %c0_24, %c0_25] : memref<2x1x128xf32, #tpu.memory_space<vmem>>, vector<2x1x128xf32>
    tpu.vector_store %arg9[%c0_23, %c0_24, %c0_25], %21 {strides = array<i32>} : memref<2x1x128xf32, #tpu.memory_space<vmem>>, vector<2x1x128xf32>,
    %c0_26 = arith.constant 0 : index
    %c0_27 = arith.constant 0 : index
    %c0_28 = arith.constant 0 : index
    %23 = vector.load %arg4[%c0_26, %c0_27, %c0_28] : memref<2x8x128xf32, #tpu.memory_space<vmem>>, vector<2x8x128xf32>
    %c0_29 = arith.constant 0 : index
    %c0_30 = arith.constant 0 : index
    %c0_31 = arith.constant 0 : index
    %24 = vector.load %arg5[%c0_29, %c0_30, %c0_31] : memref<2x8x128xf32, #tpu.memory_space<vmem>>, vector<2x8x128xf32>
    %c0_32 = arith.constant 0 : index
    %c0_33 = arith.constant 0 : index
    %c0_34 = arith.constant 0 : index
    %25 = vector.load %arg10[%c0_32, %c0_33, %c0_34] : memref<2x1x128xf32, #tpu.memory_space<vmem>>, vector<2x1x128xf32>
    %26 = arith.mulf %23, %24 : vector<2x8x128xf32>
    %cst_35 = arith.constant dense<0.000000e+00> : vector<2x128xf32>
    %27 = vector.multi_reduction <add>, %26, %cst_35 [1] : vector<2x8x128xf32> to vector<2x128xf32>
    %28 = vector.shape_cast %27 : vector<2x128xf32> to vector<2x1x128xf32>
    %29 = arith.addf %25, %28 : vector<2x1x128xf32>
    %c0_36 = arith.constant 0 : index
    %c0_37 = arith.constant 0 : index
    %c0_38 = arith.constant 0 : index
    %30 = vector.load %arg10[%c0_36, %c0_37, %c0_38] : memref<2x1x128xf32, #tpu.memory_space<vmem>>, vector<2x1x128xf32>
    tpu.vector_store %arg10[%c0_36, %c0_37, %c0_38], %29 {strides = array<i32>} : memref<2x1x128xf32, #tpu.memory_space<vmem>>, vector<2x1x128xf32>,
    %c0_39 = arith.constant 0 : index
    %c0_40 = arith.constant 0 : index
    %c0_41 = arith.constant 0 : index
    %31 = vector.load %arg11[%c0_39, %c0_40, %c0_41] : memref<2x1x128xf32, #tpu.memory_space<vmem>>, vector<2x1x128xf32>
    %32 = arith.mulf %23, %23 : vector<2x8x128xf32>
    %cst_42 = arith.constant dense<0.000000e+00> : vector<2x128xf32>
    %33 = vector.multi_reduction <add>, %32, %cst_42 [1] : vector<2x8x128xf32> to vector<2x128xf32>
    %34 = vector.shape_cast %33 : vector<2x128xf32> to vector<2x1x128xf32>
    %35 = arith.addf %31, %34 : vector<2x1x128xf32>
    %c0_43 = arith.constant 0 : index
    %c0_44 = arith.constant 0 : index
    %c0_45 = arith.constant 0 : index
    %36 = vector.load %arg11[%c0_43, %c0_44, %c0_45] : memref<2x1x128xf32, #tpu.memory_space<vmem>>, vector<2x1x128xf32>
    tpu.vector_store %arg11[%c0_43, %c0_44, %c0_45], %35 {strides = array<i32>} : memref<2x1x128xf32, #tpu.memory_space<vmem>>, vector<2x1x128xf32>,
    %c0_46 = arith.constant 0 : index
    %c0_47 = arith.constant 0 : index
    %c0_48 = arith.constant 0 : index
    %37 = vector.load %arg12[%c0_46, %c0_47, %c0_48] : memref<2x1x128xf32, #tpu.memory_space<vmem>>, vector<2x1x128xf32>
    %38 = arith.mulf %24, %24 : vector<2x8x128xf32>
    %cst_49 = arith.constant dense<0.000000e+00> : vector<2x128xf32>
    %39 = vector.multi_reduction <add>, %38, %cst_49 [1] : vector<2x8x128xf32> to vector<2x128xf32>
    %40 = vector.shape_cast %39 : vector<2x128xf32> to vector<2x1x128xf32>
    %41 = arith.addf %37, %40 : vector<2x1x128xf32>
    %c0_50 = arith.constant 0 : index
    %c0_51 = arith.constant 0 : index
    %c0_52 = arith.constant 0 : index
    %42 = vector.load %arg12[%c0_50, %c0_51, %c0_52] : memref<2x1x128xf32, #tpu.memory_space<vmem>>, vector<2x1x128xf32>
    tpu.vector_store %arg12[%c0_50, %c0_51, %c0_52], %41 {strides = array<i32>} : memref<2x1x128xf32, #tpu.memory_space<vmem>>, vector<2x1x128xf32>,
    %c0_i32_53 = arith.constant 0 : i32
    %43 = arith.cmpi eq, %arg0, %c0_i32_53 : i32
    %44 = arith.extui %43 : i1 to i32
    %c0_i32_54 = arith.constant 0 : i32
    %45 = arith.cmpi ne, %44, %c0_i32_54 : i32
    scf.if %45 {
      %c0_55 = arith.constant 0 : index
      %c0_56 = arith.constant 0 : index
      %c0_57 = arith.constant 0 : index
      %46 = vector.load %arg7[%c0_55, %c0_56, %c0_57] : memref<2x1x128xf32, #tpu.memory_space<vmem>>, vector<2x1x128xf32>
      %cst_58 = arith.constant dense<0.000000e+00> : vector<2x1xf32>
      %47 = vector.multi_reduction <add>, %46, %cst_58 [2] : vector<2x1x128xf32> to vector<2x1xf32>
      %c0_59 = arith.constant 0 : index
      %c0_60 = arith.constant 0 : index
      %c0_61 = arith.constant 0 : index
      %48 = vector.load %arg8[%c0_59, %c0_60, %c0_61] : memref<2x1x128xf32, #tpu.memory_space<vmem>>, vector<2x1x128xf32>
      %cst_62 = arith.constant dense<0.000000e+00> : vector<2x1xf32>
      %49 = vector.multi_reduction <add>, %48, %cst_62 [2] : vector<2x1x128xf32> to vector<2x1xf32>
      %c0_63 = arith.constant 0 : index
      %c0_64 = arith.constant 0 : index
      %c0_65 = arith.constant 0 : index
      %50 = vector.load %arg9[%c0_63, %c0_64, %c0_65] : memref<2x1x128xf32, #tpu.memory_space<vmem>>, vector<2x1x128xf32>
      %cst_66 = arith.constant dense<0.000000e+00> : vector<2x1xf32>
      %51 = vector.multi_reduction <add>, %50, %cst_66 [2] : vector<2x1x128xf32> to vector<2x1xf32>
      %cst_67 = arith.constant 1.000000e-24 : f32
      %52 = vector.broadcast %cst_67 : f32 to vector<2x1xf32>
      %53 = arith.maximumf %49, %52 : vector<2x1xf32>
      %54 = math.rsqrt %53 : vector<2x1xf32>
      %cst_68 = arith.constant 1.000000e-24 : f32
      %55 = vector.broadcast %cst_68 : f32 to vector<2x1xf32>
      %56 = arith.maximumf %51, %55 : vector<2x1xf32>
      %57 = math.rsqrt %56 : vector<2x1xf32>
      %58 = arith.mulf %47, %54 : vector<2x1xf32>
      %59 = arith.mulf %58, %57 : vector<2x1xf32>
      %60 = vector.shape_cast %59 : vector<2x1xf32> to vector<1x2x1xf32>
      %cst_69 = arith.constant dense<0.000000e+00> : vector<1xf32>
      %61 = vector.multi_reduction <add>, %60, %cst_69 [1, 2] : vector<1x2x1xf32> to vector<1xf32>
      %62 = vector.shape_cast %61 : vector<1xf32> to vector<1x1x1xf32>
      %63 = vector.extract %62[0, 0, 0] : f32 from vector<1x1x1xf32>
      %cst_70 = arith.constant 0.000000e+00 : f32
      %64 = arith.subf %cst_70, %63 : f32
      %c0_71 = arith.constant 0 : index
      %65 = memref.load %arg1[%c0_71] : memref<2xf32, #tpu.memory_space<smem>>
      %66 = arith.mulf %64, %65 : f32
      %c0_72 = arith.constant 0 : index
      %c0_73 = arith.constant 0 : index
      %c0_74 = arith.constant 0 : index
      %67 = vector.load %arg10[%c0_72, %c0_73, %c0_74] : memref<2x1x128xf32, #tpu.memory_space<vmem>>, vector<2x1x128xf32>
      %cst_75 = arith.constant dense<0.000000e+00> : vector<2x1xf32>
      %68 = vector.multi_reduction <add>, %67, %cst_75 [2] : vector<2x1x128xf32> to vector<2x1xf32>
      %c0_76 = arith.constant 0 : index
      %c0_77 = arith.constant 0 : index
      %c0_78 = arith.constant 0 : index
      %69 = vector.load %arg11[%c0_76, %c0_77, %c0_78] : memref<2x1x128xf32, #tpu.memory_space<vmem>>, vector<2x1x128xf32>
      %cst_79 = arith.constant dense<0.000000e+00> : vector<2x1xf32>
      %70 = vector.multi_reduction <add>, %69, %cst_79 [2] : vector<2x1x128xf32> to vector<2x1xf32>
      %c0_80 = arith.constant 0 : index
      %c0_81 = arith.constant 0 : index
      %c0_82 = arith.constant 0 : index
      %71 = vector.load %arg12[%c0_80, %c0_81, %c0_82] : memref<2x1x128xf32, #tpu.memory_space<vmem>>, vector<2x1x128xf32>
      %cst_83 = arith.constant dense<0.000000e+00> : vector<2x1xf32>
      %72 = vector.multi_reduction <add>, %71, %cst_83 [2] : vector<2x1x128xf32> to vector<2x1xf32>
      %73 = arith.mulf %70, %72 : vector<2x1xf32>
      %cst_84 = arith.constant 1.000000e-16 : f32
      %74 = vector.broadcast %cst_84 : f32 to vector<2x1xf32>
      %75 = arith.maximumf %73, %74 : vector<2x1xf32>
      %76 = math.rsqrt %75 : vector<2x1xf32>
      %77 = arith.mulf %68, %76 : vector<2x1xf32>
      %78 = vector.shape_cast %77 : vector<2x1xf32> to vector<1x2x1xf32>
      %cst_85 = arith.constant dense<0.000000e+00> : vector<1xf32>
      %79 = vector.multi_reduction <add>, %78, %cst_85 [1, 2] : vector<1x2x1xf32> to vector<1xf32>
      %80 = vector.shape_cast %79 : vector<1xf32> to vector<1x1x1xf32>
      %81 = vector.extract %80[0, 0, 0] : f32 from vector<1x1x1xf32>
      %c1 = arith.constant 1 : index
      %82 = memref.load %arg1[%c1] : memref<2xf32, #tpu.memory_space<smem>>
      %83 = arith.mulf %81, %82 : f32
      %84 = arith.subf %66, %83 : f32
      %c0_86 = arith.constant 0 : index
      %c0_87 = arith.constant 0 : index
      %85 = memref.load %arg6[%c0_86, %c0_87] : memref<1x1xf32, #tpu.memory_space<smem>>
      memref.store %84, %arg6[%c0_86, %c0_87] : memref<1x1xf32, #tpu.memory_space<smem>>
    } else {
    }
    return
  }
  func.func @transform_0(%arg0: i32) -> i32 {
    %c0_i32 = arith.constant 0 : i32
    %c0_i32_0 = arith.constant 0 : i32
    return %c0_i32 : i32
  }
  func.func @transform_1(%arg0: i32) -> (i32, i32, i32) {
    %c0_i32 = arith.constant 0 : i32
    %c0_i32_0 = arith.constant 0 : i32
    %c0_i32_1 = arith.constant 0 : i32
    return %c0_i32, %arg0, %c0_i32_0 : i32, i32, i32
  }
  func.func @transform_2(%arg0: i32) -> (i32, i32, i32) {
    %c0_i32 = arith.constant 0 : i32
    %c0_i32_0 = arith.constant 0 : i32
    %c0_i32_1 = arith.constant 0 : i32
    return %c0_i32, %arg0, %c0_i32_0 : i32, i32, i32
  }
  func.func @transform_3(%arg0: i32) -> (i32, i32, i32) {
    %c0_i32 = arith.constant 0 : i32
    %c0_i32_0 = arith.constant 0 : i32
    %c0_i32_1 = arith.constant 0 : i32
    return %c0_i32, %arg0, %c0_i32_0 : i32, i32, i32
  }
  func.func @transform_4(%arg0: i32) -> (i32, i32, i32) {
    %c0_i32 = arith.constant 0 : i32
    %c0_i32_0 = arith.constant 0 : i32
    %c0_i32_1 = arith.constant 0 : i32
    return %c0_i32, %arg0, %c0_i32_0 : i32, i32, i32
  }
  func.func @transform_5(%arg0: i32) -> (i32, i32) {
    %c0_i32 = arith.constant 0 : i32
    %c0_i32_0 = arith.constant 0 : i32
    %c0_i32_1 = arith.constant 0 : i32
    return %c0_i32, %c0_i32_0 : i32, i32
  }
}

</mosaic_0001>

<bundles_post_ra>
// kernel: tpu_custom_call.1
= control target key start
LH: loop header
LB: loop body
LE: loop exit
PB: predicated region body
PF: predicated region fallthrough
CT: control target
= control target key end

     0   :  { %10 = vsyncpa [#allocation10], 0  ;;  %s685_s0 = inlined_call_operand.hbm [shape: f32[2], index: 0, kind: input, shape index: {}]   ;;  %s686_s1 = inlined_call_operand.hbm [shape: f32[2,8,128], index: 1, kind: input, shape index: {}]   ;;  %s687_s2 = inlined_call_operand.hbm [shape: f32[2,8,128], index: 2, kind: input, shape index: {}]   ;;  %s688_s3 = inlined_call_operand.hbm [shape: f32[2,8,128], index: 3, kind: input, shape index: {}]   ;;  %s689_s4 = inlined_call_operand.hbm [shape: f32[2,8,128], index: 4, kind: input, shape index: {}]   ;;  %s690_s5 = inlined_call_operand.hbm [shape: f32[1,1], index: 5, kind: output, shape index: {}]  }
   0x1   :  { %11 = vsyncpa [#allocation9], 0 }
   0x2   :  { %12 = vsyncpa [#allocation14], 0 }
   0x3   :  { %13 = vsyncpa [#allocation17], 0 }
   0x4   :  { %14 = vsyncpa [#allocation11], 0  ;;  %s41_s20 = sshll.u32 %s687_s2, 4  ;;  %s582_s21 = smov [#allocation13]   ;;  %s42_s20 = int_to_ptr.hbm [resolvable:$true] %s41_s20 }
   0x5   :  { %s43_s22 = sshll.u32 %s582_s21, 4  ;;  %s20_s25 = sshll.u32 %s685_s0, 4  ;;  %s44_s22 = int_to_ptr.vmem [resolvable:$true] %s43_s22  ;;  %s21_s25 = int_to_ptr.hbm [resolvable:$true] %s20_s25 }
   0x6   :  { %s583_s26 = smov 128   ;;  %s584_s27 = smov 8  }
   0x7   :  { %49 = dma.hbm_to_vmem [thread:$0]  %s42_s20, 256, %s44_s22, [#allocation14], %s583_s26, %s583_s26, %s584_s27  }
   0x8   :  { %s585_s28 = smov [#allocation8]   ;;  %s28_s6 = sshll.u32 %s686_s1, 4  ;;  %s29_s6 = int_to_ptr.hbm [resolvable:$true] %s28_s6 }
   0x9   :  { %23 = dma.hbm_to_smem %s21_s25, 16, %s585_s28, [#allocation10]  }
   0xa   :  { %s586_s2 = smov [#allocation12]   ;;  %s54_s10 = sshll.u32 %s688_s3, 4  ;;  %s55_s10 = int_to_ptr.hbm [resolvable:$true] %s54_s10 }
   0xb   :  { %s30_s7 = sshll.u32 %s586_s2, 4  ;;  %s587_s0 = smov [#allocation15]   ;;  %s31_s7 = int_to_ptr.vmem [resolvable:$true] %s30_s7 }
   0xc   :  { %36 = dma.hbm_to_vmem [thread:$0]  %s29_s6, 256, %s31_s7, [#allocation9], %s583_s26, %s583_s26, %s584_s27  }
   0xd   :  { %s56_s11 = sshll.u32 %s587_s0, 4  ;;  %s67_s14 = sshll.u32 %s689_s4, 4  ;;  %s57_s11 = int_to_ptr.vmem [resolvable:$true] %s56_s11  ;;  %s68_s14 = int_to_ptr.hbm [resolvable:$true] %s67_s14 }
   0xe   :  { %62 = dma.hbm_to_vmem [thread:$0]  %s55_s10, 256, %s57_s11, [#allocation14], %s583_s26, %s583_s26, %s584_s27  }
   0xf   :  { %s588_s1 = smov [#allocation16]  }
  0x10   :  { %s69_s15 = sshll.u32 %s588_s1, 4  ;;  %s70_s15 = int_to_ptr.vmem [resolvable:$true] %s69_s15 }
  0x11   :  { %75 = dma.hbm_to_vmem [thread:$0]  %s68_s14, 256, %s70_s15, [#allocation17], %s583_s26, %s583_s26, %s584_s27  }
  0x12   :  { %572 = dma.done.wait [#allocation10], 16  }
  0x13   :  { %573 = vsyncadd [#allocation10], 4294967280 }
  0x14   :  { %574 = dma.done.wait [#allocation9], 256  }
  0x15   :  { %575 = vsyncadd [#allocation9], 4294967040 }
  0x16   :  { %576 = dma.done.wait [#allocation14], 512  }
  0x17   :  { %577 = vsyncadd [#allocation14], 4294966784 }
  0x18   :  { %578 = dma.done.wait [#allocation17], 256  }
  0x19   :  { %579 = vsyncadd [#allocation17], 4294967040 }
  0x1a   :  { %96 = sfence }
  0x1b   :  { %v180_v0 = vld [vmem:[#allocation16 + $0x8] sm:$0xff]  ;;  %v114_v2 = vld [vmem:[#allocation12 + $0x8] sm:$0xff]  ;;  %v589_v3 = vmov 0.0   ;;  %v115_v8 = vld [vmem:[#allocation13] sm:$0xff]  ;;  %vm246_vm0 = vcmask 1040384   ;;  %vm320_vm15 = vcmask 1041409  }
  0x1c   :  { %v116_v1 = vld [vmem:[#allocation13 + $0x8] sm:$0xff]  ;;  %112 = vst [vmem:[#allocation7 + $0x1] sm:$0x1] %v589_v3  ;;  %v224_v4 = vmul.f32 %v180_v0, %v180_v0  ;;  %v140_v6 = vmul.f32 %v114_v2, %v114_v2  ;;  %v178_v7 = vld [vmem:[#allocation15 + $0x8] sm:$0xff]  ;;  %v113_v9 = vld [vmem:[#allocation12] sm:$0xff]  ;;  %v159_v12 = vmul.f32 %v115_v8, %v115_v8  ;;  %s335_s3 = sld [smem:[#allocation8]] }
  0x1d   :  { %v160_v5 = vmul.f32 %v116_v1, %v116_v1  ;;  %v636_v10 = vmul.f32 %v116_v1, %v114_v2  ;;  %101 = vst [vmem:[#allocation2] sm:$0x1] %v589_v3  ;;  %v204_v11 = vmul.f32 %v178_v7, %v178_v7  ;;  %v139_v13 = vmul.f32 %v113_v9, %v113_v9  ;;  %v638_v14 = vld [vmem:[#allocation16] sm:$0xff]  ;;  %v640_v15 = vld [vmem:[#allocation15] sm:$0xff]  ;;  %s426_s16 = sld [smem:[#allocation8 + $0x1]]  ;;  %s412_s20 = sshll.u32 %s690_s5, 4  ;;  %s413_s20 = int_to_ptr.hbm [resolvable:$true] %s412_s20 }
  0x1e   :  { %v642_v16 = vmul.f32 %v115_v8, %v113_v9  ;;  %v231_v17 = vrot.slane %v224_v4, 4  ;;  %102 = vst [vmem:[#allocation2 + $0x1] sm:$0x1] %v589_v3  ;;  %v147_v19 = vrot.slane %v140_v6, 4  ;;  %v223_v20 = vmul.f32 %v638_v14, %v638_v14  ;;  %s590_s25 = smov [#allocation18]  }
  0x1f   :  { %v167_v18 = vrot.slane %v160_v5, 4  ;;  %103 = vst [vmem:[#allocation3] sm:$0x1] %v589_v3  ;;  %v211_v21 = vrot.slane %v204_v11, 4  ;;  %v161_v22 = vrot.slane %v159_v12, 4  ;;  %v141_v23 = vrot.slane %v139_v13, 4 }
  0x20   :  { %v203_v24 = vmul.f32 %v640_v15, %v640_v15  ;;  %v232_v25 = vadd.f32 %v231_v17, %v224_v4  ;;  %104 = vst [vmem:[#allocation3 + $0x1] sm:$0x1] %v589_v3  ;;  %v148_v27 = vadd.f32 %v147_v19, %v140_v6  ;;  %v225_v28 = vrot.slane %v223_v20, 4 }
  0x21   :  { %v168_v26 = vadd.f32 %v167_v18, %v160_v5  ;;  %105 = vst [vmem:[#allocation4] sm:$0x1] %v589_v3  ;;  %v212_v29 = vadd.f32 %v211_v21, %v204_v11  ;;  %v162_v30 = vadd.f32 %v161_v22, %v159_v12  ;;  %v142_v31 = vadd.f32 %v141_v23, %v139_v13 }
  0x22   :  { %v205_v32 = vrot.slane %v203_v24, 4  ;;  %v233_v33 = vrot.slane %v232_v25, 2  ;;  %106 = vst [vmem:[#allocation4 + $0x1] sm:$0x1] %v589_v3  ;;  %v149_v35 = vrot.slane %v148_v27, 2  ;;  %v226_v36 = vadd.f32 %v225_v28, %v223_v20 }
  0x23   :  { %v169_v34 = vrot.slane %v168_v26, 2  ;;  %107 = vst [vmem:[#allocation5] sm:$0x1] %v589_v3  ;;  %v213_v37 = vrot.slane %v212_v29, 2  ;;  %v163_v38 = vrot.slane %v162_v30, 2  ;;  %v184_v40 = vmul.f32 %v180_v0, %v178_v7 }
  0x24   :  { %v206_v39 = vadd.f32 %v205_v32, %v203_v24  ;;  %v234_v41 = vadd.f32 %v233_v33, %v232_v25  ;;  %108 = vst [vmem:[#allocation5 + $0x1] sm:$0x1] %v589_v3  ;;  %v150_v43 = vadd.f32 %v149_v35, %v148_v27  ;;  %v143_v44 = vrot.slane %v142_v31, 2  ;;  %v222_v45 = vld [vmem:[#allocation7 + $0x1] sm:$0x1] }
  0x25   :  { %v170_v42 = vadd.f32 %v169_v34, %v168_v26  ;;  %109 = vst [vmem:[#allocation6] sm:$0x1] %v589_v3  ;;  %v214_v46 = vadd.f32 %v213_v37, %v212_v29  ;;  %v164_v47 = vadd.f32 %v163_v38, %v162_v30  ;;  %v227_v48 = vrot.slane %v226_v36, 2 }
  0x26   :  { %v207_v49 = vrot.slane %v206_v39, 2  ;;  %v235_v50 = vrot.slane %v234_v41, 1  ;;  %110 = vst [vmem:[#allocation6 + $0x1] sm:$0x1] %v589_v3  ;;  %v151_v52 = vrot.slane %v150_v43, 1  ;;  %v144_v53 = vadd.f32 %v143_v44, %v142_v31 }
  0x27   :  { %v171_v51 = vrot.slane %v170_v42, 1  ;;  %111 = vst [vmem:[#allocation7] sm:$0x1] %v589_v3  ;;  %v138_v54 = vld [vmem:[#allocation3 + $0x1] sm:$0x1]  ;;  %v215_v55 = vrot.slane %v214_v46, 1  ;;  %v228_v57 = vadd.f32 %v227_v48, %v226_v36  ;;  %v183_v21 = vmul.f32 %v638_v14, %v640_v15 }
  0x28   :  { %v165_v56 = vrot.slane %v164_v47, 1  ;;  %v208_v58 = vadd.f32 %v207_v49, %v206_v39  ;;  %v236_v59 = vadd.f32 %v235_v50, %v234_v41  ;;  %v152_v61 = vadd.f32 %v151_v52, %v150_v43  ;;  %v157_v62 = vld [vmem:[#allocation4] sm:$0x1]  ;;  %v137_v9 = vld [vmem:[#allocation3] sm:$0x1] }
  0x29   :  { %v172_v60 = vadd.f32 %v171_v51, %v170_v42  ;;  %v145_v63 = vrot.slane %v144_v53, 1  ;;  %v158_v0 = vld [vmem:[#allocation4 + $0x1] sm:$0x1]  ;;  %v216_v1 = vadd.f32 %v215_v55, %v214_v46  ;;  %v229_v4 = vrot.slane %v228_v57, 1  ;;  %v117_v39 = vld [vmem:[#allocation2] sm:$0x1] }
  0x2a   :  { %v166_v2 = vadd.f32 %v165_v56, %v164_v47  ;;  %v209_v5 = vrot.slane %v208_v58, 1  ;;  %v238_v6 = vadd.f32 %v236_v59, %v222_v45  ;;  %v154_v8 = vadd.f32 %v152_v61, %v138_v54  ;;  %v181_v55 = vld [vmem:[#allocation5] sm:$0x1] }
  0x2b   :  { %v174_v7 = vadd.f32 %v172_v60, %v158_v0  ;;  %v146_v3 = vadd.f32 %v145_v63, %v144_v53  ;;  %v230_v12 = vadd.f32 %v229_v4, %v228_v57  ;;  %v127_v17 = vrot.slane %v636_v10, 4  ;;  %v182_v48 = vld [vmem:[#allocation5 + $0x1] sm:$0x1] }
  0x2c   :  { %v173_v11 = vadd.f32 %v166_v2, %v157_v62  ;;  %v210_v13 = vadd.f32 %v209_v5, %v208_v58  ;;  %240 = vst [vmem:[#allocation7 + $0x1] sm:$0x1] %v238_v6  ;;  %v201_v18 = vld [vmem:[#allocation6] sm:$0x1]  ;;  %v121_v19 = vrot.slane %v642_v16, 4  ;;  %v191_v20 = vrot.slane %v184_v40, 4 }
  0x2d   :  { %176 = vst [vmem:[#allocation4 + $0x1] sm:$0x1] %v174_v7  ;;  %v202_v22 = vld [vmem:[#allocation6 + $0x1] sm:$0x1]  ;;  %v153_v23 = vadd.f32 %v146_v3, %v137_v9  ;;  %v128_v24 = vadd.f32 %v127_v17, %v636_v10  ;;  %v185_v29 = vrot.slane %v183_v21, 4 }
  0x2e   :  { %156 = vst [vmem:[#allocation3 + $0x1] sm:$0x1] %v154_v8  ;;  %v218_v25 = vadd.f32 %v216_v1, %v202_v22  ;;  %v221_v26 = vld [vmem:[#allocation7] sm:$0x1]  ;;  %v122_v27 = vadd.f32 %v121_v19, %v642_v16  ;;  %v192_v28 = vadd.f32 %v191_v20, %v184_v40  ;;  %v217_v31 = vadd.f32 %v210_v13, %v201_v18  ;;  %v118_v10 = vld [vmem:[#allocation2 + $0x1] sm:$0x1] }
  0x2f   :  { %175 = vst [vmem:[#allocation4] sm:$0x1] %v173_v11  ;;  %v237_v30 = vadd.f32 %v230_v12, %v221_v26  ;;  %v129_v32 = vrot.slane %v128_v24, 2  ;;  %v186_v14 = vadd.f32 %v185_v29, %v183_v21 }
  0x30   :  { %220 = vst [vmem:[#allocation6 + $0x1] sm:$0x1] %v218_v25  ;;  %v123_v33 = vrot.slane %v122_v27, 2  ;;  %v193_v34 = vrot.slane %v192_v28, 2 }
  0x31   :  { %155 = vst [vmem:[#allocation3] sm:$0x1] %v153_v23  ;;  %v130_v15 = vadd.f32 %v129_v32, %v128_v24  ;;  %v187_v37 = vrot.slane %v186_v14, 2 }
  0x32   :  { %239 = vst [vmem:[#allocation7] sm:$0x1] %v237_v30  ;;  %v124_v35 = vadd.f32 %v123_v33, %v122_v27  ;;  %v194_v36 = vadd.f32 %v193_v34, %v192_v28 }
  0x33   :  { %v354_v38 = vld [vmem:[#allocation7 + $0x1] sm:$0x1]  ;;  %219 = vst [vmem:[#allocation6] sm:$0x1] %v217_v31  ;;  %v131_v16 = vrot.slane %v130_v15, 1  ;;  %v188_v44 = vadd.f32 %v187_v37, %v186_v14 }
  0x34   :  { %v358_v40 = vsel %vm246_vm0, %v354_v38, 0.0  ;;  %v262_v41 = vld [vmem:[#allocation4 + $0x1] sm:$0x1]  ;;  %v125_v42 = vrot.slane %v124_v35, 1  ;;  %v195_v43 = vrot.slane %v194_v36, 1 }
  0x35   :  { %359 = vadd.xlane.f32.xlu2 %v358_v40  ;;  %v266_v45 = vsel %vm246_vm0, %v262_v41, 0.0  ;;  %v254_v46 = vld [vmem:[#allocation3 + $0x1] sm:$0x1]  ;;  %v132_v47 = vadd.f32 %v131_v16, %v130_v15  ;;  %v189_v52 = vrot.slane %v188_v44, 1 }
  0x36   :  { %267 = vadd.xlane.f32.xlu1 %v266_v45  ;;  %v258_v49 = vsel %vm246_vm0, %v254_v46, 0.0  ;;  %v126_v50 = vadd.f32 %v125_v42, %v124_v35  ;;  %v196_v51 = vadd.f32 %v195_v43, %v194_v36  ;;  %v261_v53 = vld [vmem:[#allocation4] sm:$0x1] }
  0x37   :  { %259 = vadd.xlane.f32.xlu0 %v258_v49  ;;  %v134_v54 = vadd.f32 %v132_v47, %v118_v10  ;;  %v346_v56 = vld [vmem:[#allocation6 + $0x1] sm:$0x1]  ;;  %v190_v59 = vadd.f32 %v189_v52, %v188_v44  ;;  %v263_v61 = vsel %vm246_vm0, %v261_v53, 0.0 }
  0x38   :  { %v133_v57 = vadd.f32 %v126_v50, %v117_v39  ;;  %v198_v58 = vadd.f32 %v196_v51, %v182_v48  ;;  %v253_v60 = vld [vmem:[#allocation3] sm:$0x1]  ;;  %v350_v63 = vsel %vm246_vm0, %v346_v56, 0.0 }
  0x39   :  { %136 = vst [vmem:[#allocation2 + $0x1] sm:$0x1] %v134_v54  ;;  %v197_v62 = vadd.f32 %v190_v59, %v181_v55  ;;  %v255_v0 = vsel %vm246_vm0, %v253_v60, 0.0  ;;  %v353_v1 = vld [vmem:[#allocation7] sm:$0x1] }
  0x3a   :  { %135 = vst [vmem:[#allocation2] sm:$0x1] %v133_v57  ;;  %v345_v4 = vld [vmem:[#allocation6] sm:$0x1]  ;;  %v355_v6 = vsel %vm246_vm0, %v353_v1, 0.0 }
  0x3b   :  { %200 = vst [vmem:[#allocation5 + $0x1] sm:$0x1] %v198_v58  ;;  %v347_v7 = vsel %vm246_vm0, %v345_v4, 0.0 }
  0x3c   :  { %199 = vst [vmem:[#allocation5] sm:$0x1] %v197_v62 }
  0x3d   :  { %264 = vadd.xlane.f32.xlu2 %v263_v61 }
  0x3e   :  { %351 = vadd.xlane.f32.xlu1 %v350_v63 }
  0x3f   :  { %256 = vadd.xlane.f32.xlu0 %v255_v0 }
  0x40   :  { %v245_v2 = vld [vmem:[#allocation2 + $0x1] sm:$0x1] }
  0x41   :  { %v250_v5 = vsel %vm246_vm0, %v245_v2, 0.0  ;;  %v244_v3 = vld [vmem:[#allocation2] sm:$0x1] }
  0x42   :  { %v338_v9 = vld [vmem:[#allocation5 + $0x1] sm:$0x1]  ;;  %v247_v13 = vsel %vm246_vm0, %v244_v3, 0.0 }
  0x43   :  { %v337_v8 = vld [vmem:[#allocation5] sm:$0x1]  ;;  %v342_v12 = vsel %vm246_vm0, %v338_v9, 0.0 }
  0x44   :  { %v339_v11 = vsel %vm246_vm0, %v337_v8, 0.0 }
  0x45   :  { %251 = vadd.xlane.f32.xlu2 %v250_v5 }
  0x46   :  { %356 = vadd.xlane.f32.xlu1 %v355_v6 }
  0x47   :  { %348 = vadd.xlane.f32.xlu0 %v347_v7 }
  0x4d   :  { %340 = vadd.xlane.f32.xlu2 %v339_v11 }
  0x4e   :  { %343 = vadd.xlane.f32.xlu1 %v342_v12 }
  0x4f   :  { %248 = vadd.xlane.f32.xlu0 %v247_v13 }
  0xa8   :  { %v360_v17 = vpop.xlane.xlu2 %359 }
  0xa9   :  { %v268_v18 = vpop.xlane.xlu1 %267 }
  0xaa   :  { %v292_v19 = vmax.f32 %v268_v18, 1e-24  ;;  %v260_v20 = vpop.xlane.xlu0 %259 }
  0xab   :  { %v270_v21 = vmax.f32 %v260_v20, 1e-24 }
  0xac   :  { %440 = vrsqrt.f32 %v292_v19  ;;  %vm309_vm5 = vweird.f32 %v292_v19 }
  0xad   :  { %442 = vrsqrt.f32 %v270_v21  ;;  %vm287_vm2 = vweird.f32 %v270_v21 }
  0xb0   :  { %v265_v22 = vpop.xlane.xlu2 %264 }
  0xb1   :  { %v352_v23 = vpop.xlane.xlu1 %351  ;;  %v666_v24 = vmax.f32 %v265_v22, 1e-24 }
  0xb2   :  { %v441_v25 = vpop.eup %440  ;;  %v362_v26 = vmul.f32 %v360_v17, %v352_v23  ;;  %v257_v27 = vpop.xlane.xlu0 %256 }
  0xb3   :  { %v443_v28 = vpop.eup %442  ;;  %v304_v29 = vmul.f32 %v441_v25, %v292_v19  ;;  %444 = vrsqrt.f32 %v666_v24  ;;  %v269_v30 = vmax.f32 %v257_v27, 1e-24  ;;  %vm310_vm4 = vweird.f32 %v441_v25 }
  0xb4   :  { %v282_v31 = vmul.f32 %v443_v28, %v270_v21  ;;  %v669_v32 = vmax.f32 %v362_v26, 1e-16  ;;  %vm288_vm1 = vweird.f32 %v443_v28  ;;  %vm299_vm7 = vweird.f32 %v666_v24  ;;  %vm311_vm8 = vmor %vm309_vm5, %vm310_vm4 }
  0xb5   :  { %v305_v33 = vmul.f32 %v441_v25, %v304_v29  ;;  %446 = vrsqrt.f32 %v269_v30  ;;  %vm289_vm3 = vmor %vm287_vm2, %vm288_vm1  ;;  %vm277_vm9 = vweird.f32 %v269_v30  ;;  %vm323_vm1 = vcmask 1024  }
  0xb6   :  { %v283_v34 = vmul.f32 %v443_v28, %v282_v31  ;;  %448 = vrsqrt.f32 %v669_v32  ;;  %vm381_vm14 = vweird.f32 %v669_v32 }
  0xb7   :  { %v306_v14 = vmul.f32 0.5, %v305_v33 }
  0xb8   :  { %v284_v15 = vmul.f32 0.5, %v283_v34  ;;  %v252_v50 = vpop.xlane.xlu2 %251 }
  0xb9   :  { %v445_v10 = vpop.eup %444  ;;  %v357_v35 = vpop.xlane.xlu1 %356  ;;  %v307_v41 = vsub.f32 1.5, %v306_v14 }
  0xba   :  { %v294_v36 = vmul.f32 %v445_v10, %v666_v24  ;;  %v349_v37 = vpop.xlane.xlu0 %348  ;;  %v285_v38 = vsub.f32 1.5, %v284_v15  ;;  %vm300_vm10 = vweird.f32 %v445_v10 }
  0xbb   :  { %v447_v16 = vpop.eup %446  ;;  %v361_v39 = vmul.f32 %v357_v35, %v349_v37  ;;  %v308_v54 = vmul.f32 %v441_v25, %v307_v41  ;;  %vm301_vm13 = vmor %vm299_vm7, %vm300_vm10 }
  0xbc   :  { %v449_v40 = vpop.eup %448  ;;  %v295_v42 = vmul.f32 %v445_v10, %v294_v36  ;;  %v272_v43 = vmul.f32 %v447_v16, %v269_v30  ;;  %v286_v44 = vmul.f32 %v443_v28, %v285_v38  ;;  %vm278_vm6 = vweird.f32 %v447_v16 }
  0xbd   :  { %v376_v45 = vmul.f32 %v449_v40, %v669_v32  ;;  %v363_v46 = vmax.f32 %v361_v39, 1e-16  ;;  %v312_v59 = vsel %vm311_vm8, %v441_v25, %v308_v54  ;;  %vm279_vm11 = vmor %vm277_vm9, %vm278_vm6  ;;  %vm382_vm12 = vweird.f32 %v449_v40 }
  0xbe   :  { %v296_v47 = vmul.f32 0.5, %v295_v42  ;;  %v273_v48 = vmul.f32 %v447_v16, %v272_v43  ;;  %v290_v49 = vsel %vm289_vm3, %v443_v28, %v286_v44  ;;  %vm383_vm0 = vmor %vm381_vm14, %vm382_vm12 }
  0xbf   :  { %v377_v51 = vmul.f32 %v449_v40, %v376_v45  ;;  %450 = vrsqrt.f32 %v363_v46  ;;  %v314_v56 = vmul.f32 %v290_v49, %v252_v50  ;;  %vm371_vm3 = vweird.f32 %v363_v46 }
  0xc0   :  { %v297_v52 = vsub.f32 1.5, %v296_v47  ;;  %v274_v53 = vmul.f32 0.5, %v273_v48  ;;  %v341_v21 = vpop.xlane.xlu2 %340 }
  0xc1   :  { %v378_v55 = vmul.f32 0.5, %v377_v51  ;;  %v316_v0 = vmul.f32 %v314_v56, %v312_v59  ;;  %v344_v12 = vpop.xlane.xlu1 %343 }
  0xc2   :  { %v275_v57 = vsub.f32 1.5, %v274_v53  ;;  %v298_v61 = vmul.f32 %v445_v10, %v297_v52  ;;  %v249_v62 = vpop.xlane.xlu0 %248 }
  0xc3   :  { %v379_v58 = vsub.f32 1.5, %v378_v55  ;;  %v319_v8 = vrot.slane %v316_v0, 7 }
  0xc4   :  { %v276_v60 = vmul.f32 %v447_v16, %v275_v57  ;;  %v302_v7 = vsel %vm301_vm13, %v445_v10, %v298_v61 }
  0xc5   :  { %v451_v63 = vpop.eup %450  ;;  %v380_v4 = vmul.f32 %v449_v40, %v379_v58 }
  0xc6   :  { %v366_v1 = vmul.f32 %v451_v63, %v363_v46  ;;  %v280_v2 = vsel %vm279_vm11, %v447_v16, %v276_v60  ;;  %vm372_vm2 = vweird.f32 %v451_v63 }
  0xc7   :  { %v313_v5 = vmul.f32 %v280_v2, %v249_v62  ;;  %v384_v11 = vsel %vm383_vm0, %v449_v40, %v380_v4  ;;  %vm373_vm4 = vmor %vm371_vm3, %vm372_vm2 }
  0xc8   :  { %v367_v6 = vmul.f32 %v451_v63, %v366_v1  ;;  %v386_v19 = vmul.f32 %v384_v11, %v344_v12 }
  0xc9   :  { %v315_v9 = vmul.f32 %v313_v5, %v302_v7 }
  0xca   :  { %v368_v3 = vmul.f32 0.5, %v367_v6  ;;  %v389_v23 = vrot.slane %v386_v19, 7 }
  0xcb   :  { %v321_v13 = vsel %vm320_vm15, %v319_v8, %v315_v9 }
  0xcc   :  { %v324_v17 = vsel %vm323_vm1, %v321_v13, 0.0  ;;  %v369_v18 = vsub.f32 1.5, %v368_v3 }
  0xcd   :  { %325 = vadd.xlane.f32.xlu0 %v324_v17 }
  0xce   :  { %v370_v20 = vmul.f32 %v451_v63, %v369_v18 }
  0xd0   :  { %v374_v22 = vsel %vm373_vm4, %v451_v63, %v370_v20 }
  0xd1   :  { %v385_v24 = vmul.f32 %v374_v22, %v341_v21 }
  0xd3   :  { %v390_v25 = vsel %vm320_vm15, %v389_v23, %v385_v24 }
  0xd4   :  { %v392_v26 = vsel %vm323_vm1, %v390_v25, 0.0 }
  0xd5   :  { %393 = vadd.xlane.f32.xlu1 %v392_v26 }
 0x140   :  { %v326_v27 = vpop.xlane.xlu0 %325 }
 0x141   :  { %v327_v28 = vrot.slane %v326_v27, 4 }
 0x143   :  { %v328_v29 = vadd.f32 %v327_v28, %v326_v27 }
 0x145   :  { %v329_v30 = vrot.slane %v328_v29, 2 }
 0x147   :  { %v330_v31 = vadd.f32 %v329_v30, %v328_v29 }
 0x148   :  { %v394_v32 = vpop.xlane.xlu1 %393 }
 0x149   :  { %v395_v33 = vrot.slane %v394_v32, 4  ;;  %v331_v34 = vrot.slane %v330_v31, 1 }
 0x14b   :  { %v396_v14 = vadd.f32 %v395_v33, %v394_v32  ;;  %v332_v15 = vadd.f32 %v331_v34, %v330_v31 }
 0x14d   :  { %v397_v10 = vrot.slane %v396_v14, 2  ;;  %427 = vpush %v332_v15 }
 0x14f   :  { %v398_v35 = vadd.f32 %v397_v10, %v396_v14 }
 0x151   :  { %v399_v36 = vrot.slane %v398_v35, 1 }
 0x153   :  { %v400_v37 = vadd.f32 %v399_v36, %v398_v35 }
 0x155   :  { %429 = vpush %v400_v37 }
 0x17e   :  { %s428_s4 = spop %427 }
 0x17f   :  { %s334_s17 = ssub.f32 0.0, %s428_s4 }
 0x181   :  { %s336_s21 = smul.f32 %s335_s3, %s334_s17 }
 0x186   :  { %s430_s22 = spop %429 }
 0x187   :  { %s403_s23 = smul.f32 %s430_s22, %s426_s16 }
 0x189   :  { %s404_s24 = ssub.f32 %s336_s21, %s403_s23 }
 0x18b   :  { %406 = sst [smem:[#allocation18]] %s404_s24 }
 0x18c   :  { %415 = dma.smem_to_hbm %s590_s25, 16, %s413_s20, [#allocation11]  }
 0x18d   :  { %580 = dma.done.wait [#allocation11], 16  }
 0x18e   :  { %581 = vsyncadd [#allocation11], 4294967280 }
 0x18f   :  { %420 = sfence }
 0x190   :  { %421 = vsyncpa [#allocation9], 1 }
 0x191   :  { %422 = vsyncpa [#allocation14], 1 }
 0x192   :  { %423 = vsyncpa [#allocation17], 1 }
 0x193   :  { %424 = vsyncpa [#allocation10], 1 }
 0x194   :  { %425 = vsyncpa [#allocation11], 1 }

</bundles_post_ra>
